<compile_context>
chip_gen: v5e
topology: v5e:2x2
jax: 0.10.0
libtpu: 0.0.40
codegen_flags: <defaults>
</compile_context>

<pallas_src>
import functools

import jax
import jax.numpy as jnp
from jax.experimental import pallas as pl
from jax.experimental.pallas import tpu as pltpu

MIN_SCORE = 0.05   # TopKPooling(min_score=0.05)
TOL = 1e-7         # PyG topk() tolerance
EPS_KL = 1e-14     # torch.log(score + 1e-14)


def _net_kernel(nl_ref, ax_ref, w_ref, s_ref, out_ref, *, C, G, H, N):
    f32 = jnp.float32
    bf16 = jnp.bfloat16
    dot = lambda a, b: jnp.dot(a, b, preferred_element_type=f32)

    # ---- per-instance lane-major node data [8, N] f32:
    #      rows 0:C = x^T, rows C:C+G = one-hot graph membership B,
    #      row C+G = ground-truth attention.
    nl = nl_ref[...]
    xT = nl[0:C, :]                          # [C, N]
    Bm = nl[C:C + G, :]                      # [G, N]
    attn_row = nl[C + G:C + G + 1, :]        # [1, N]
    keep_g = Bm > 0.5                        # [G, N] bool

    # ---- shared small f32 params [8, H] (VMEM-resident across the grid)
    sp = s_ref[...]
    b1a = sp[0:1, :]
    b1b = sp[1:2, :]
    b2a = sp[2:3, :]
    b2b = sp[3:4, :]
    linw_row = sp[4:5, :]                    # Linear(64,1).weight as a row
    linb = sp[5:6, 0:1]                      # [1, 1]
    # row 6, cols 0:C hold the TopKPooling weight (poolw)

    # ---- shared bf16 weights [3H + N + C, H] (VMEM-resident):
    #      [w1b ; w2a ; w2b ; eye(N) ; w1a]
    w1b = w_ref[0:H, :]
    w2a = w_ref[H:2 * H, :]
    w2b = w_ref[2 * H:3 * H, :]
    eye_bf = w_ref[3 * H:3 * H + N, 0:N]     # identity, hoisted out of the kernel
    w1a_f = w_ref[3 * H + N:3 * H + N + C, :].astype(f32)   # [C, H]

    # ---- per-instance bf16 block [N, N + C]: (adj + I) | x
    ax = ax_ref[...]
    A_bf = ax[:, 0:N]                        # [N, N] bf16, A = adj + I (adj[dst,src])
    x_cols = ax[:, N:N + C].astype(f32)      # [N, C]

    # ---- conv1 = GINConv(Lin(C,H) -> ReLU -> Lin(H,H)), eps=0, then outer ReLU.
    #      K=C first Lin on the VPU (rank-1 accumulation) so the serial MXU
    #      chain does not start with a K=4 fill/drain.
    xw = x_cols[:, 0:1] * w1a_f[0:1, :]
    for c in range(1, C):
        xw = xw + x_cols[:, c:c + 1] * w1a_f[c:c + 1, :]               # [N, H] f32
    z1 = jnp.maximum(dot(A_bf, xw.astype(bf16)) + b1a, 0.0)
    out1 = jnp.maximum(dot(z1.astype(bf16), w1b) + b1b, 0.0)           # [N, H] f32
    out1_bf = out1.astype(bf16)

    # ---- pool1 = TopKPooling(C, min_score=0.05) on the ORIGINAL x (attn = x).
    #      Lane-major [1,N]/[G,N] score/softmax/threshold path, all f32, VPU/XLU.
    raw = xT[0:1, :] * sp[6:7, 0:1]
    for c in range(1, C):
        raw = raw + xT[c:c + 1, :] * sp[6:7, c:c + 1]                  # [1, N]

    neg = f32(-1e30)
    gmax = jnp.max(jnp.where(keep_g, raw, neg), axis=1, keepdims=True)   # [G,1]
    node_max = jnp.sum(Bm * gmax, axis=0, keepdims=True)                 # [1,N]
    e = jnp.exp(raw - node_max)
    gsum = jnp.sum(Bm * e, axis=1, keepdims=True)                        # [G,1]
    denom = jnp.sum(Bm * gsum, axis=0, keepdims=True)                    # [1,N]
    score = e / denom                                                    # [1,N]

    s_gmax = jnp.max(jnp.where(keep_g, score, neg), axis=1, keepdims=True)
    thr = jnp.minimum(s_gmax - f32(TOL), f32(MIN_SCORE))                 # [G,1]
    node_thr = jnp.sum(Bm * thr, axis=0, keepdims=True)                  # [1,N]
    mask = (score > node_thr).astype(f32)                                # [1,N]

    # ---- conv2 on the filtered subgraph, then F.relu.
    #      pooled = out1 * score; only kept->kept edges contribute.  Fold the
    #      per-node column scaling into the adjacency (all bf16, no f32 [N,N]):
    #        A2 = A*(s*m) + diag(s*(1-m)),  A = adj + I.
    sm = score * mask                                                    # [1,N]
    A2 = A_bf * sm.astype(bf16) + eye_bf * (score - sm).astype(bf16)     # [N,N]
    h2 = dot(A2, out1_bf)                                                # [N,H]
    z2 = jnp.maximum(dot(h2.astype(bf16), w2a) + b2a, 0.0)
    out2 = jnp.maximum(dot(z2.astype(bf16), w2b) + b2b, 0.0)             # [N,H]

    # ---- global_add_pool over kept nodes (mask folded into B) + Linear(H, 1)
    Bmask = (Bm * mask).astype(bf16)                                     # [G,N]
    gfeat = dot(Bmask, out2.astype(bf16))                                # [G,H]
    pred = jnp.sum(gfeat * linw_row, axis=1, keepdims=True) + linb       # [G,1]

    # ---- attn_loss = kl_div(log(score+1e-14), attn[perm]); scatter_mean/graph.
    #      target == 0 contributes 0 (xlogy semantics).
    pos = attn_row > 0.0
    log_t = jnp.log(jnp.where(pos, attn_row, 1.0))
    kl = jnp.where(pos, attn_row * (log_t - jnp.log(score + f32(EPS_KL))), 0.0)
    loss_sum = jnp.sum(Bm * (kl * mask), axis=1, keepdims=True)          # [G,1]
    cnt = jnp.sum(Bm * mask, axis=1, keepdims=True)                      # [G,1]
    loss = loss_sum / jnp.maximum(cnt, f32(1.0))

    # ---- ratio = kept_nodes / total_nodes
    ratio = jnp.sum(mask, axis=1, keepdims=True) * f32(1.0 / N)          # [1,1]
    ratio_col = jnp.broadcast_to(ratio, (G, 1))

    # ---- compose [8,128] result in registers; one full unmasked store:
    #      col 0 = pred, col 1 = loss, col 2 = ratio
    payload = jnp.concatenate(
        [pred, loss, ratio_col, jnp.zeros((G, 128 - 3), f32)], axis=1)   # [G,128]
    if G < 8:
        payload = jnp.concatenate(
            [payload, jnp.zeros((8 - G, 128), f32)], axis=0)             # [8,128]
    out_ref[...] = payload


def net_forward(x, adj, B, attn, params):
    """Batched forward over Bi independent graph mini-batches.

    x:    [Bi, N, C]  node features
    adj:  [Bi, N, N]  dense adjacency (adj[dst, src])
    B:    [Bi, G, N]  one-hot graph membership
    attn: [Bi, N]     ground-truth attention (per-graph distribution)
    params: (w1a, b1a, w1b, b1b, poolw, w2a, b2a, w2b, b2b, linw, linb)
    """
    Bi, N, C = x.shape
    G = B.shape[1]
    (w1a, b1a, w1b, b1b, poolw, w2a, b2a, w2b, b2b, linw, linb) = params
    H = w1b.shape[0]
    assert C + G + 1 <= 8 and C <= H and N <= H and G < 8

    f32, bf16 = jnp.float32, jnp.bfloat16

    # per-instance lane-major packed node data [Bi, 8, N]
    nl = jnp.zeros((Bi, 8, N), f32)
    nl = nl.at[:, 0:C, :].set(jnp.swapaxes(x, 1, 2).astype(f32))
    nl = nl.at[:, C:C + G, :].set(B.astype(f32))
    nl = nl.at[:, C + G, :].set(attn.astype(f32))

    # per-instance bf16 block [Bi, N, N + C]: (adj + I) | x
    A = adj.astype(f32) + jnp.eye(N, dtype=f32)
    ax = jnp.concatenate([A, x.astype(f32)], axis=-1).astype(bf16)

    # shared bf16 weights [3H + N + C, H]: w1b | w2a | w2b | eye(N) | w1a
    wbuf = jnp.zeros((3 * H + N + C, H), f32)
    wbuf = wbuf.at[0:H, :].set(w1b)
    wbuf = wbuf.at[H:2 * H, :].set(w2a)
    wbuf = wbuf.at[2 * H:3 * H, :].set(w2b)
    wbuf = wbuf.at[3 * H:3 * H + N, 0:N].set(jnp.eye(N, dtype=f32))
    wbuf = wbuf.at[3 * H + N:3 * H + N + C, :].set(w1a)
    wbuf = wbuf.astype(bf16)

    # shared small f32 params [8, H]
    sp = jnp.zeros((8, H), f32)
    sp = sp.at[0, :].set(b1a.reshape(-1))
    sp = sp.at[1, :].set(b1b.reshape(-1))
    sp = sp.at[2, :].set(b2a.reshape(-1))
    sp = sp.at[3, :].set(b2b.reshape(-1))
    sp = sp.at[4, :].set(linw.reshape(-1))
    sp = sp.at[5, 0].set(linb.reshape(-1)[0])
    sp = sp.at[6, 0:C].set(poolw.reshape(-1))

    flops = 2 * Bi * (N * C * H + 2 * N * N * H + 3 * N * H * H + G * N * H)
    bytes_accessed = (nl.size * 4 + ax.size * 2 + wbuf.size * 2 + sp.size * 4
                      + Bi * 8 * 128 * 4)

    out = pl.pallas_call(
        functools.partial(_net_kernel, C=C, G=G, H=H, N=N),
        grid=(Bi,),
        in_specs=[
            pl.BlockSpec((None, 8, N), lambda b: (b, 0, 0)),        # per-instance
            pl.BlockSpec((None, N, N + C), lambda b: (b, 0, 0)),    # per-instance
            pl.BlockSpec((3 * H + N + C, H), lambda b: (0, 0)),     # resident weights
            pl.BlockSpec((8, H), lambda b: (0, 0)),                 # resident params
        ],
        out_specs=pl.BlockSpec((None, 8, 128), lambda b: (b, 0, 0)),
        out_shape=jax.ShapeDtypeStruct((Bi, 8, 128), f32),
        compiler_params=pltpu.CompilerParams(
            dimension_semantics=("parallel",)),
        cost_estimate=pl.CostEstimate(
            flops=flops, transcendentals=3 * Bi * N,
            bytes_accessed=bytes_accessed),
    )(nl, ax, wbuf, sp)

    pred = out[:, 0:G, 0]     # [Bi, G] per-graph prediction
    loss = out[:, 0:G, 1]     # [Bi, G] per-graph KL attention loss (mean/kept)
    ratio = out[:, 0, 2]      # [Bi]    kept / total nodes
    return pred, loss, ratio


if __name__ == "__main__":
    key = jax.random.PRNGKey(0)
    Bi, N, C, G, E, H = 4, 32, 4, 2, 64, 64   # instances, nodes, in_ch, graphs/inst, edges, hidden
    keys = jax.random.split(key, 8)

    # --- per-instance graph data: two graphs of 16 nodes, random intra-graph edges
    x = jax.random.normal(keys[0], (Bi, N, C), jnp.float32)
    batch_vec = jnp.concatenate([jnp.zeros(N // 2, jnp.int32),
                                 jnp.ones(N // 2, jnp.int32)])
    Bmat = (batch_vec[None, :] == jnp.arange(G)[:, None]).astype(jnp.float32)   # [G, N]
    Bmat = jnp.broadcast_to(Bmat, (Bi, G, N))

    src0 = jax.random.randint(keys[1], (Bi, E // 2), 0, N // 2)
    dst0 = jax.random.randint(keys[2], (Bi, E // 2), 0, N // 2)
    src1 = jax.random.randint(keys[3], (Bi, E // 2), N // 2, N)
    dst1 = jax.random.randint(keys[4], (Bi, E // 2), N // 2, N)
    src = jnp.concatenate([src0, src1], axis=1)
    dst = jnp.concatenate([dst0, dst1], axis=1)
    binst = jnp.broadcast_to(jnp.arange(Bi)[:, None], src.shape)
    adj = jnp.zeros((Bi, N, N), jnp.float32).at[binst, dst, src].add(1.0)       # adj[dst, src]

    # ground-truth attention: per-graph softmax of a random per-node score
    a_raw = jax.random.normal(keys[5], (Bi, N), jnp.float32)
    masked = jnp.where(Bmat > 0.5, a_raw[:, None, :], -jnp.inf)                 # [Bi,G,N]
    g_max = jnp.max(masked, axis=2)                                             # [Bi,G]
    node_max = jnp.einsum('bgn,bg->bn', Bmat, g_max)
    a_exp = jnp.exp(a_raw - node_max)
    g_den = jnp.einsum('bgn,bn->bg', Bmat, a_exp)
    node_den = jnp.einsum('bgn,bg->bn', Bmat, g_den)
    attn = a_exp / node_den                                                     # [Bi,N]

    # --- deterministic synthetic parameters (shapes from Net.__init__)
    def lin_init(k, fan_in, fan_out):
        kw, kb = jax.random.split(k)
        w = jax.random.normal(kw, (fan_in, fan_out), jnp.float32) * 0.1
        b = jax.random.normal(kb, (1, fan_out), jnp.float32) * 0.1
        return w, b

    pkeys = jax.random.split(keys[6], 6)
    w1a, b1a = lin_init(pkeys[0], C, H)        # conv1.nn: Lin(C, 64)
    w1b, b1b = lin_init(pkeys[1], H, H)        # conv1.nn: Lin(64, 64)
    poolw = jax.random.normal(pkeys[2], (C, 1), jnp.float32)   # TopKPooling weight
    w2a, b2a = lin_init(pkeys[3], H, H)        # conv2.nn: Lin(64, 64)
    w2b, b2b = lin_init(pkeys[4], H, H)        # conv2.nn: Lin(64, 64)
    linw, linb = lin_init(pkeys[5], H, 1)      # lin: Linear(64, 1)
    params = (w1a, b1a, w1b, b1b, poolw, w2a, b2a, w2b, b2b, linw, linb)

    pred, attn_loss, ratio = net_forward(x, adj, Bmat, attn, params)
    jax.block_until_ready((pred, attn_loss, ratio))
    assert bool(jnp.all(jnp.isfinite(pred))) and bool(jnp.all(jnp.isfinite(attn_loss)))
    assert bool(jnp.all((ratio > 0.0) & (ratio <= 1.0)))
    print("KERNEL_OK")
</pallas_src>

<mosaic_0001>
module attributes {stable_mosaic.version = 11 : i64} {
  func.func @_net_kernel(%arg0: i32, %arg1: memref<1x8x32xf32, #tpu.memory_space<vmem>>, %arg2: memref<1x32x36xbf16, #tpu.memory_space<vmem>>, %arg3: memref<228x64xbf16, #tpu.memory_space<vmem>>, %arg4: memref<8x64xf32, #tpu.memory_space<vmem>>, %arg5: memref<1x8x128xf32, #tpu.memory_space<vmem>>) attributes {dimension_semantics = [#tpu.dimension_semantics<parallel>], iteration_bounds = array<i64: 4>, scalar_prefetch = 0 : i64, scratch_operands = 0 : i64, tpu.core_type = #tpu.core_type<tc>, window_params = [{transform_indices = @transform_0, window_bounds = array<i64: 1, 8, 32>}, {transform_indices = @transform_1, window_bounds = array<i64: 1, 32, 36>}, {pipeline_mode = #tpu.pipeline_mode<synchronous>, transform_indices = @transform_2, window_bounds = array<i64: 228, 64>}, {pipeline_mode = #tpu.pipeline_mode<synchronous>, transform_indices = @transform_3, window_bounds = array<i64: 8, 64>}, {transform_indices = @transform_4, window_bounds = array<i64: 1, 8, 128>}]} {
    %c0 = arith.constant 0 : index
    %c0_0 = arith.constant 0 : index
    %c0_1 = arith.constant 0 : index
    %0 = vector.load %arg1[%c0, %c0_0, %c0_1] : memref<1x8x32xf32, #tpu.memory_space<vmem>>, vector<1x8x32xf32>
    %1 = vector.shape_cast %0 : vector<1x8x32xf32> to vector<8x32xf32>
    %2 = vector.extract_strided_slice %1 {offsets = [0, 0], sizes = [4, 32], strides = [1, 1]} : vector<8x32xf32> to vector<4x32xf32>
    %3 = vector.extract_strided_slice %1 {offsets = [4, 0], sizes = [2, 32], strides = [1, 1]} : vector<8x32xf32> to vector<2x32xf32>
    %4 = vector.extract_strided_slice %1 {offsets = [6, 0], sizes = [1, 32], strides = [1, 1]} : vector<8x32xf32> to vector<1x32xf32>
    %cst = arith.constant 5.000000e-01 : f32
    %5 = vector.broadcast %cst : f32 to vector<2x32xf32>
    %6 = arith.cmpf ogt, %3, %5 : vector<2x32xf32>
    %c0_2 = arith.constant 0 : index
    %c0_3 = arith.constant 0 : index
    %7 = vector.load %arg4[%c0_2, %c0_3] : memref<8x64xf32, #tpu.memory_space<vmem>>, vector<8x64xf32>
    %8 = vector.extract_strided_slice %7 {offsets = [0, 0], sizes = [1, 64], strides = [1, 1]} : vector<8x64xf32> to vector<1x64xf32>
    %9 = vector.extract_strided_slice %7 {offsets = [1, 0], sizes = [1, 64], strides = [1, 1]} : vector<8x64xf32> to vector<1x64xf32>
    %10 = vector.extract_strided_slice %7 {offsets = [2, 0], sizes = [1, 64], strides = [1, 1]} : vector<8x64xf32> to vector<1x64xf32>
    %11 = vector.extract_strided_slice %7 {offsets = [3, 0], sizes = [1, 64], strides = [1, 1]} : vector<8x64xf32> to vector<1x64xf32>
    %12 = vector.extract_strided_slice %7 {offsets = [4, 0], sizes = [1, 64], strides = [1, 1]} : vector<8x64xf32> to vector<1x64xf32>
    %13 = vector.extract_strided_slice %7 {offsets = [5, 0], sizes = [1, 1], strides = [1, 1]} : vector<8x64xf32> to vector<1x1xf32>
    %c0_4 = arith.constant 0 : index
    %c0_5 = arith.constant 0 : index
    %14 = vector.load %arg3[%c0_4, %c0_5] : memref<228x64xbf16, #tpu.memory_space<vmem>>, vector<64x64xbf16>
    %c64 = arith.constant 64 : index
    %c0_6 = arith.constant 0 : index
    %15 = vector.load %arg3[%c64, %c0_6] : memref<228x64xbf16, #tpu.memory_space<vmem>>, vector<64x64xbf16>
    %c128 = arith.constant 128 : index
    %c0_7 = arith.constant 0 : index
    %16 = vector.load %arg3[%c128, %c0_7] : memref<228x64xbf16, #tpu.memory_space<vmem>>, vector<64x64xbf16>
    %c192 = arith.constant 192 : index
    %c0_8 = arith.constant 0 : index
    %17 = vector.load %arg3[%c192, %c0_8] : memref<228x64xbf16, #tpu.memory_space<vmem>>, vector<32x32xbf16>
    %c224 = arith.constant 224 : index
    %c0_9 = arith.constant 0 : index
    %18 = vector.load %arg3[%c224, %c0_9] : memref<228x64xbf16, #tpu.memory_space<vmem>>, vector<4x64xbf16>
    %19 = arith.extf %18 : vector<4x64xbf16> to vector<4x64xf32>
    %c0_10 = arith.constant 0 : index
    %c0_11 = arith.constant 0 : index
    %c0_12 = arith.constant 0 : index
    %20 = vector.load %arg2[%c0_10, %c0_11, %c0_12] : memref<1x32x36xbf16, #tpu.memory_space<vmem>>, vector<1x32x36xbf16>
    %21 = vector.shape_cast %20 : vector<1x32x36xbf16> to vector<32x36xbf16>
    %22 = vector.extract_strided_slice %21 {offsets = [0, 0], sizes = [32, 32], strides = [1, 1]} : vector<32x36xbf16> to vector<32x32xbf16>
    %23 = vector.extract_strided_slice %21 {offsets = [0, 32], sizes = [32, 4], strides = [1, 1]} : vector<32x36xbf16> to vector<32x4xbf16>
    %24 = arith.extf %23 : vector<32x4xbf16> to vector<32x4xf32>
    %25 = vector.extract_strided_slice %24 {offsets = [0, 0], sizes = [32, 1], strides = [1, 1]} : vector<32x4xf32> to vector<32x1xf32>
    %26 = vector.extract_strided_slice %19 {offsets = [0, 0], sizes = [1, 64], strides = [1, 1]} : vector<4x64xf32> to vector<1x64xf32>
    %27 = vector.broadcast %25 : vector<32x1xf32> to vector<32x64xf32>
    %28 = vector.broadcast %26 : vector<1x64xf32> to vector<32x64xf32>
    %29 = arith.mulf %27, %28 : vector<32x64xf32>
    %30 = vector.extract_strided_slice %24 {offsets = [0, 1], sizes = [32, 1], strides = [1, 1]} : vector<32x4xf32> to vector<32x1xf32>
    %31 = vector.extract_strided_slice %19 {offsets = [1, 0], sizes = [1, 64], strides = [1, 1]} : vector<4x64xf32> to vector<1x64xf32>
    %32 = vector.broadcast %30 : vector<32x1xf32> to vector<32x64xf32>
    %33 = vector.broadcast %31 : vector<1x64xf32> to vector<32x64xf32>
    %34 = arith.mulf %32, %33 : vector<32x64xf32>
    %35 = arith.addf %29, %34 : vector<32x64xf32>
    %36 = vector.extract_strided_slice %24 {offsets = [0, 2], sizes = [32, 1], strides = [1, 1]} : vector<32x4xf32> to vector<32x1xf32>
    %37 = vector.extract_strided_slice %19 {offsets = [2, 0], sizes = [1, 64], strides = [1, 1]} : vector<4x64xf32> to vector<1x64xf32>
    %38 = vector.broadcast %36 : vector<32x1xf32> to vector<32x64xf32>
    %39 = vector.broadcast %37 : vector<1x64xf32> to vector<32x64xf32>
    %40 = arith.mulf %38, %39 : vector<32x64xf32>
    %41 = arith.addf %35, %40 : vector<32x64xf32>
    %42 = vector.extract_strided_slice %24 {offsets = [0, 3], sizes = [32, 1], strides = [1, 1]} : vector<32x4xf32> to vector<32x1xf32>
    %43 = vector.extract_strided_slice %19 {offsets = [3, 0], sizes = [1, 64], strides = [1, 1]} : vector<4x64xf32> to vector<1x64xf32>
    %44 = vector.broadcast %42 : vector<32x1xf32> to vector<32x64xf32>
    %45 = vector.broadcast %43 : vector<1x64xf32> to vector<32x64xf32>
    %46 = arith.mulf %44, %45 : vector<32x64xf32>
    %47 = arith.addf %41, %46 : vector<32x64xf32>
    %48 = arith.truncf %47 : vector<32x64xf32> to vector<32x64xbf16>
    %cst_13 = arith.constant dense<0.000000e+00> : vector<32x64xf32>
    %49 = tpu.matmul %22, %48, %cst_13 {dimension_numbers = #tpu.dot_dimension_numbers<[1], [0], [0], [1], [0, 0, 1, 1], [], []>} : vector<32x32xbf16>, vector<32x64xbf16>, vector<32x64xf32> -> vector<32x64xf32>
    %50 = vector.broadcast %8 : vector<1x64xf32> to vector<32x64xf32>
    %51 = arith.addf %49, %50 : vector<32x64xf32>
    %cst_14 = arith.constant 0.000000e+00 : f32
    %52 = vector.broadcast %cst_14 : f32 to vector<32x64xf32>
    %53 = arith.maximumf %51, %52 : vector<32x64xf32>
    %54 = arith.truncf %53 : vector<32x64xf32> to vector<32x64xbf16>
    %cst_15 = arith.constant dense<0.000000e+00> : vector<32x64xf32>
    %55 = tpu.matmul %54, %14, %cst_15 {dimension_numbers = #tpu.dot_dimension_numbers<[1], [0], [0], [1], [0, 0, 1, 1], [], []>} : vector<32x64xbf16>, vector<64x64xbf16>, vector<32x64xf32> -> vector<32x64xf32>
    %56 = vector.broadcast %9 : vector<1x64xf32> to vector<32x64xf32>
    %57 = arith.addf %55, %56 : vector<32x64xf32>
    %cst_16 = arith.constant 0.000000e+00 : f32
    %58 = vector.broadcast %cst_16 : f32 to vector<32x64xf32>
    %59 = arith.maximumf %57, %58 : vector<32x64xf32>
    %60 = arith.truncf %59 : vector<32x64xf32> to vector<32x64xbf16>
    %61 = vector.extract_strided_slice %2 {offsets = [0, 0], sizes = [1, 32], strides = [1, 1]} : vector<4x32xf32> to vector<1x32xf32>
    %62 = vector.extract_strided_slice %7 {offsets = [6, 0], sizes = [1, 1], strides = [1, 1]} : vector<8x64xf32> to vector<1x1xf32>
    %63 = vector.broadcast %62 : vector<1x1xf32> to vector<1x32xf32>
    %64 = arith.mulf %61, %63 : vector<1x32xf32>
    %65 = vector.extract_strided_slice %2 {offsets = [1, 0], sizes = [1, 32], strides = [1, 1]} : vector<4x32xf32> to vector<1x32xf32>
    %66 = vector.extract_strided_slice %7 {offsets = [6, 1], sizes = [1, 1], strides = [1, 1]} : vector<8x64xf32> to vector<1x1xf32>
    %67 = vector.broadcast %66 : vector<1x1xf32> to vector<1x32xf32>
    %68 = arith.mulf %65, %67 : vector<1x32xf32>
    %69 = arith.addf %64, %68 : vector<1x32xf32>
    %70 = vector.extract_strided_slice %2 {offsets = [2, 0], sizes = [1, 32], strides = [1, 1]} : vector<4x32xf32> to vector<1x32xf32>
    %71 = vector.extract_strided_slice %7 {offsets = [6, 2], sizes = [1, 1], strides = [1, 1]} : vector<8x64xf32> to vector<1x1xf32>
    %72 = vector.broadcast %71 : vector<1x1xf32> to vector<1x32xf32>
    %73 = arith.mulf %70, %72 : vector<1x32xf32>
    %74 = arith.addf %69, %73 : vector<1x32xf32>
    %75 = vector.extract_strided_slice %2 {offsets = [3, 0], sizes = [1, 32], strides = [1, 1]} : vector<4x32xf32> to vector<1x32xf32>
    %76 = vector.extract_strided_slice %7 {offsets = [6, 3], sizes = [1, 1], strides = [1, 1]} : vector<8x64xf32> to vector<1x1xf32>
    %77 = vector.broadcast %76 : vector<1x1xf32> to vector<1x32xf32>
    %78 = arith.mulf %75, %77 : vector<1x32xf32>
    %79 = arith.addf %74, %78 : vector<1x32xf32>
    %cst_17 = arith.constant -1.000000e+30 : f32
    %80 = vector.shape_cast %79 : vector<1x32xf32> to vector<1x32xf32>
    %81 = vector.broadcast %80 : vector<1x32xf32> to vector<2x32xf32>
    %82 = vector.broadcast %cst_17 : f32 to vector<2x32xf32>
    %83 = arith.select %6, %81, %82 : vector<2x32xi1>, vector<2x32xf32>
    %cst_18 = arith.constant dense<0xFF800000> : vector<2xf32>
    %84 = vector.multi_reduction <maximumf>, %83, %cst_18 [1] : vector<2x32xf32> to vector<2xf32>
    %85 = vector.shape_cast %84 : vector<2xf32> to vector<2x1xf32>
    %86 = vector.broadcast %85 : vector<2x1xf32> to vector<2x32xf32>
    %87 = arith.mulf %3, %86 : vector<2x32xf32>
    %cst_19 = arith.constant dense<0.000000e+00> : vector<32xf32>
    %88 = vector.multi_reduction <add>, %87, %cst_19 [0] : vector<2x32xf32> to vector<32xf32>
    %89 = vector.shape_cast %88 : vector<32xf32> to vector<1x32xf32>
    %90 = arith.subf %79, %89 : vector<1x32xf32>
    %91 = math.exp %90 : vector<1x32xf32>
    %92 = vector.broadcast %91 : vector<1x32xf32> to vector<2x32xf32>
    %93 = arith.mulf %3, %92 : vector<2x32xf32>
    %cst_20 = arith.constant dense<0.000000e+00> : vector<2xf32>
    %94 = vector.multi_reduction <add>, %93, %cst_20 [1] : vector<2x32xf32> to vector<2xf32>
    %95 = vector.shape_cast %94 : vector<2xf32> to vector<2x1xf32>
    %96 = vector.broadcast %95 : vector<2x1xf32> to vector<2x32xf32>
    %97 = arith.mulf %3, %96 : vector<2x32xf32>
    %cst_21 = arith.constant dense<0.000000e+00> : vector<32xf32>
    %98 = vector.multi_reduction <add>, %97, %cst_21 [0] : vector<2x32xf32> to vector<32xf32>
    %99 = vector.shape_cast %98 : vector<32xf32> to vector<1x32xf32>
    %100 = arith.divf %91, %99 : vector<1x32xf32>
    %cst_22 = arith.constant -1.000000e+30 : f32
    %101 = vector.shape_cast %100 : vector<1x32xf32> to vector<1x32xf32>
    %102 = vector.broadcast %101 : vector<1x32xf32> to vector<2x32xf32>
    %103 = vector.broadcast %cst_22 : f32 to vector<2x32xf32>
    %104 = arith.select %6, %102, %103 : vector<2x32xi1>, vector<2x32xf32>
    %cst_23 = arith.constant dense<0xFF800000> : vector<2xf32>
    %105 = vector.multi_reduction <maximumf>, %104, %cst_23 [1] : vector<2x32xf32> to vector<2xf32>
    %106 = vector.shape_cast %105 : vector<2xf32> to vector<2x1xf32>
    %cst_24 = arith.constant 1.000000e-07 : f32
    %107 = vector.broadcast %cst_24 : f32 to vector<2x1xf32>
    %108 = arith.subf %106, %107 : vector<2x1xf32>
    %cst_25 = arith.constant 5.000000e-02 : f32
    %109 = vector.broadcast %cst_25 : f32 to vector<2x1xf32>
    %110 = arith.minimumf %108, %109 : vector<2x1xf32>
    %111 = vector.broadcast %110 : vector<2x1xf32> to vector<2x32xf32>
    %112 = arith.mulf %3, %111 : vector<2x32xf32>
    %cst_26 = arith.constant dense<0.000000e+00> : vector<32xf32>
    %113 = vector.multi_reduction <add>, %112, %cst_26 [0] : vector<2x32xf32> to vector<32xf32>
    %114 = vector.shape_cast %113 : vector<32xf32> to vector<1x32xf32>
    %115 = arith.cmpf ogt, %100, %114 : vector<1x32xf32>
    %116 = arith.extui %115 : vector<1x32xi1> to vector<1x32xi32>
    %117 = arith.sitofp %116 : vector<1x32xi32> to vector<1x32xf32>
    %118 = arith.mulf %100, %117 : vector<1x32xf32>
    %119 = arith.truncf %118 : vector<1x32xf32> to vector<1x32xbf16>
    %120 = vector.broadcast %119 : vector<1x32xbf16> to vector<32x32xbf16>
    %121 = arith.mulf %22, %120 : vector<32x32xbf16>
    %122 = arith.subf %100, %118 : vector<1x32xf32>
    %123 = arith.truncf %122 : vector<1x32xf32> to vector<1x32xbf16>
    %124 = vector.broadcast %123 : vector<1x32xbf16> to vector<32x32xbf16>
    %125 = arith.mulf %17, %124 : vector<32x32xbf16>
    %126 = arith.addf %121, %125 : vector<32x32xbf16>
    %cst_27 = arith.constant dense<0.000000e+00> : vector<32x64xf32>
    %127 = tpu.matmul %126, %60, %cst_27 {dimension_numbers = #tpu.dot_dimension_numbers<[1], [0], [0], [1], [0, 0, 1, 1], [], []>} : vector<32x32xbf16>, vector<32x64xbf16>, vector<32x64xf32> -> vector<32x64xf32>
    %128 = arith.truncf %127 : vector<32x64xf32> to vector<32x64xbf16>
    %cst_28 = arith.constant dense<0.000000e+00> : vector<32x64xf32>
    %129 = tpu.matmul %128, %15, %cst_28 {dimension_numbers = #tpu.dot_dimension_numbers<[1], [0], [0], [1], [0, 0, 1, 1], [], []>} : vector<32x64xbf16>, vector<64x64xbf16>, vector<32x64xf32> -> vector<32x64xf32>
    %130 = vector.broadcast %10 : vector<1x64xf32> to vector<32x64xf32>
    %131 = arith.addf %129, %130 : vector<32x64xf32>
    %cst_29 = arith.constant 0.000000e+00 : f32
    %132 = vector.broadcast %cst_29 : f32 to vector<32x64xf32>
    %133 = arith.maximumf %131, %132 : vector<32x64xf32>
    %134 = arith.truncf %133 : vector<32x64xf32> to vector<32x64xbf16>
    %cst_30 = arith.constant dense<0.000000e+00> : vector<32x64xf32>
    %135 = tpu.matmul %134, %16, %cst_30 {dimension_numbers = #tpu.dot_dimension_numbers<[1], [0], [0], [1], [0, 0, 1, 1], [], []>} : vector<32x64xbf16>, vector<64x64xbf16>, vector<32x64xf32> -> vector<32x64xf32>
    %136 = vector.broadcast %11 : vector<1x64xf32> to vector<32x64xf32>
    %137 = arith.addf %135, %136 : vector<32x64xf32>
    %cst_31 = arith.constant 0.000000e+00 : f32
    %138 = vector.broadcast %cst_31 : f32 to vector<32x64xf32>
    %139 = arith.maximumf %137, %138 : vector<32x64xf32>
    %140 = vector.broadcast %117 : vector<1x32xf32> to vector<2x32xf32>
    %141 = arith.mulf %3, %140 : vector<2x32xf32>
    %142 = arith.truncf %141 : vector<2x32xf32> to vector<2x32xbf16>
    %143 = arith.truncf %139 : vector<32x64xf32> to vector<32x64xbf16>
    %cst_32 = arith.constant dense<0.000000e+00> : vector<2x64xf32>
    %144 = tpu.matmul %142, %143, %cst_32 {dimension_numbers = #tpu.dot_dimension_numbers<[1], [0], [0], [1], [0, 0, 1, 1], [], []>} : vector<2x32xbf16>, vector<32x64xbf16>, vector<2x64xf32> -> vector<2x64xf32>
    %145 = vector.broadcast %12 : vector<1x64xf32> to vector<2x64xf32>
    %146 = arith.mulf %144, %145 : vector<2x64xf32>
    %cst_33 = arith.constant dense<0.000000e+00> : vector<2xf32>
    %147 = vector.multi_reduction <add>, %146, %cst_33 [1] : vector<2x64xf32> to vector<2xf32>
    %148 = vector.shape_cast %147 : vector<2xf32> to vector<2x1xf32>
    %149 = vector.broadcast %13 : vector<1x1xf32> to vector<2x1xf32>
    %150 = arith.addf %148, %149 : vector<2x1xf32>
    %cst_34 = arith.constant 0.000000e+00 : f32
    %151 = vector.broadcast %cst_34 : f32 to vector<1x32xf32>
    %152 = arith.cmpf ogt, %4, %151 : vector<1x32xf32>
    %cst_35 = arith.constant 1.000000e+00 : f32
    %153 = vector.broadcast %cst_35 : f32 to vector<1x32xf32>
    %154 = arith.select %152, %4, %153 : vector<1x32xi1>, vector<1x32xf32>
    %155 = math.log %154 : vector<1x32xf32>
    %cst_36 = arith.constant 9.99999982E-15 : f32
    %156 = vector.broadcast %cst_36 : f32 to vector<1x32xf32>
    %157 = arith.addf %100, %156 : vector<1x32xf32>
    %158 = math.log %157 : vector<1x32xf32>
    %159 = arith.subf %155, %158 : vector<1x32xf32>
    %160 = arith.mulf %4, %159 : vector<1x32xf32>
    %cst_37 = arith.constant 0.000000e+00 : f32
    %161 = vector.broadcast %cst_37 : f32 to vector<1x32xf32>
    %162 = arith.select %152, %160, %161 : vector<1x32xi1>, vector<1x32xf32>
    %163 = arith.mulf %162, %117 : vector<1x32xf32>
    %164 = vector.broadcast %163 : vector<1x32xf32> to vector<2x32xf32>
    %165 = arith.mulf %3, %164 : vector<2x32xf32>
    %cst_38 = arith.constant dense<0.000000e+00> : vector<2xf32>
    %166 = vector.multi_reduction <add>, %165, %cst_38 [1] : vector<2x32xf32> to vector<2xf32>
    %167 = vector.shape_cast %166 : vector<2xf32> to vector<2x1xf32>
    %168 = vector.broadcast %117 : vector<1x32xf32> to vector<2x32xf32>
    %169 = arith.mulf %3, %168 : vector<2x32xf32>
    %cst_39 = arith.constant dense<0.000000e+00> : vector<2xf32>
    %170 = vector.multi_reduction <add>, %169, %cst_39 [1] : vector<2x32xf32> to vector<2xf32>
    %171 = vector.shape_cast %170 : vector<2xf32> to vector<2x1xf32>
    %cst_40 = arith.constant 1.000000e+00 : f32
    %172 = vector.broadcast %cst_40 : f32 to vector<2x1xf32>
    %173 = arith.maximumf %171, %172 : vector<2x1xf32>
    %174 = arith.divf %167, %173 : vector<2x1xf32>
    %cst_41 = arith.constant dense<0.000000e+00> : vector<1xf32>
    %175 = vector.multi_reduction <add>, %117, %cst_41 [1] : vector<1x32xf32> to vector<1xf32>
    %176 = vector.shape_cast %175 : vector<1xf32> to vector<1x1xf32>
    %cst_42 = arith.constant 3.125000e-02 : f32
    %177 = vector.broadcast %cst_42 : f32 to vector<1x1xf32>
    %178 = arith.mulf %176, %177 : vector<1x1xf32>
    %179 = vector.shape_cast %178 : vector<1x1xf32> to vector<1x1xf32>
    %180 = vector.broadcast %179 : vector<1x1xf32> to vector<2x1xf32>
    %cst_43 = arith.constant 0.000000e+00 : f32
    %181 = vector.broadcast %cst_43 : f32 to vector<2x125xf32>
    %182 = tpu.concatenate %150, %174, %180, %181 in 1 : vector<2x1xf32>, vector<2x1xf32>, vector<2x1xf32>, vector<2x125xf32> -> vector<2x128xf32>
    %cst_44 = arith.constant 0.000000e+00 : f32
    %183 = vector.broadcast %cst_44 : f32 to vector<6x128xf32>
    %184 = tpu.concatenate %182, %183 in 0 : vector<2x128xf32>, vector<6x128xf32> -> vector<8x128xf32>
    %c0_45 = arith.constant 0 : index
    %c0_46 = arith.constant 0 : index
    %c0_47 = arith.constant 0 : index
    %185 = vector.load %arg5[%c0_45, %c0_46, %c0_47] : memref<1x8x128xf32, #tpu.memory_space<vmem>>, vector<1x8x128xf32>
    %186 = vector.shape_cast %185 : vector<1x8x128xf32> to vector<8x128xf32>
    %187 = vector.shape_cast %184 : vector<8x128xf32> to vector<1x8x128xf32>
    tpu.vector_store %arg5[%c0_45, %c0_46, %c0_47], %187 {strides = array<i32>} : memref<1x8x128xf32, #tpu.memory_space<vmem>>, vector<1x8x128xf32>,
    return
  }
  func.func @transform_0(%arg0: i32) -> (i32, i32, i32) {
    %c0_i32 = arith.constant 0 : i32
    %c0_i32_0 = arith.constant 0 : i32
    %c0_i32_1 = arith.constant 0 : i32
    return %arg0, %c0_i32, %c0_i32_0 : i32, i32, i32
  }
  func.func @transform_1(%arg0: i32) -> (i32, i32, i32) {
    %c0_i32 = arith.constant 0 : i32
    %c0_i32_0 = arith.constant 0 : i32
    %c0_i32_1 = arith.constant 0 : i32
    return %arg0, %c0_i32, %c0_i32_0 : i32, i32, i32
  }
  func.func @transform_2(%arg0: i32) -> (i32, i32) {
    %c0_i32 = arith.constant 0 : i32
    %c0_i32_0 = arith.constant 0 : i32
    %c0_i32_1 = arith.constant 0 : i32
    return %c0_i32, %c0_i32_0 : i32, i32
  }
  func.func @transform_3(%arg0: i32) -> (i32, i32) {
    %c0_i32 = arith.constant 0 : i32
    %c0_i32_0 = arith.constant 0 : i32
    %c0_i32_1 = arith.constant 0 : i32
    return %c0_i32, %c0_i32_0 : i32, i32
  }
  func.func @transform_4(%arg0: i32) -> (i32, i32, i32) {
    %c0_i32 = arith.constant 0 : i32
    %c0_i32_0 = arith.constant 0 : i32
    %c0_i32_1 = arith.constant 0 : i32
    return %arg0, %c0_i32, %c0_i32_0 : i32, i32, i32
  }
}

</mosaic_0001>

<bundles_post_ra>
// kernel: tpu_custom_call.1
= control target key start
LH: loop header
LB: loop body
LE: loop exit
PB: predicated region body
PF: predicated region fallthrough
CT: control target
= control target key end

     0   :  { %9 = vsyncpa [#allocation3], 0  ;;  %s1475_s0 = inlined_call_operand.vmem [shape: f32[4,8,32], index: 0, kind: input, shape index: {}]   ;;  %s1476_s1 = inlined_call_operand.vmem [shape: bf16[4,32,36], index: 1, kind: input, shape index: {}]   ;;  %s1477_s2 = inlined_call_operand.vmem [shape: bf16[228,64], index: 2, kind: input, shape index: {}]   ;;  %s1478_s3 = inlined_call_operand.vmem [shape: f32[8,64], index: 3, kind: input, shape index: {}]   ;;  %s1479_s4 = inlined_call_operand.hbm [shape: f32[4,8,128], index: 4, kind: output, shape index: {}]  }
   0x1   :  { %11 = vsyncpa [#allocation3 + $0x1], 0  ;;  %s1245_s15 = smov 0   ;;  %s1247_s16 = smov 0  }
   0x2   :  { %s1249_s17 = smov 0   ;;  %s1251_s18 = smov 0  }
   0x3 LB: > { %s1266_s19 = sadd.s32 4294967295, %s1209_s18   ;;  %s929_s20 = sadd.s32 4294967294, %s1209_s18   ;;  %s1209_s18 = sphi %s1251_s18, %s1485_s18   ;;  %s1205_s17 = sphi %s1249_s17, %s1484_s17   ;;  %s1201_s16 = sphi %s1247_s16, %s1483_s16   ;;  %s1197_s15 = sphi %s1245_s15, %s1482_s15  }
   0x4   : > { %s1270_s21 = sadd.s32 1, %s1209_s18   ;;  %s118_s22 = sadd.s32 1, %s1205_s17 }
   0x5   : > { %s115_s23 = ssub.s32 %s1209_s18, %s1270_s21  ;;  %p128_p0 = scmp.ne.s32.totalorder %s1205_s17, %s1201_s16 }
   0x6   : > { %p116_p1 = scmp.eq.s32.totalorder %s115_s23, 0  ;;  %p129_p2 = scmp.eq.s32.totalorder %s1266_s19, 3 }
   0x7   : > { %p134_p3 = scmp.ne.s32.totalorder %s1201_s16, %s1197_s15  ;;  %p135_p4 = scmp.eq.s32.totalorder %s929_s20, 3 }
   0x8   : > { %s1281_s24 = scalar_select %p116_p1, %s1205_s17, %s118_s22  }
   0x9   : > { %p1283_p5 = por %p129_p2, %p128_p0  ;;  %p1287_p6 = por %p135_p4, %p134_p3 }
   0xa   : > { %p932_p7 = scmp.ge.s32.totalorder %s1209_s18, 1  ;;  %p174_p8 = scmp.lt.s32.totalorder %s1209_s18, 5 }
   0xc   : > { %p175_p9 = pnand %p932_p7, %p174_p8 }
   0xd   : > { %p204_p10 = scmp.lt.s32.totalorder (!%p175_p9), %s1266_s19, 3  ;;  %s201_s8 = sand.u32 (!%p175_p9), 1, %s1201_s16  }
   0xe   : > { %178 = sbr.rel (%p175_p9) target bundleno = 1368 (0x558), region = 36  ;;  %s933_s9 = sshll.u32 (!%p175_p9), %s201_s8, 3 }
   0xf   : > { %s203_s14 = scalar_lea.vmem (!%p175_p9), [#allocation2], %s933_s9  ;;  %s1167_s30 = scalar_lea.hbm (!%p175_p9), %s1479_s4, 32 }
  0x10   : > { %s855_s20 = sshll.u32 (!%p175_p9), %s203_s14, 4  ;;  %s856_s20 = int_to_ptr.vmem [resolvable:$true] %s855_s20 }
  0x13   : > { %v1211_v0 = vmov 34   ;;  %v1212_v1 = vmov 32   ;;  %s1295_s27 = scalar_select %p204_p10, %s1266_s19, 3  ;;  %v1213_v2 = vmov 33   ;;  %v1214_v11 = vmov 35   ;;  %v1324_v12 = vld [vmem:[%s1478_s3] sm:$0xff] }
  0x14   : > { %1097 = vset.pattern.permute.xlu1 %v1211_v0  ;;  %1085 = vset.pattern.permute.xlu0 %v1212_v1  ;;  %v1215_v13 = vmov 1   ;;  %v1216_v14 = vmov 0   ;;  %v1217_v15 = vmov 3   ;;  %v1218_v16 = vmov 2   ;;  %v245_v20 = vld [vmem:[%s1477_s2 + $0x70] sm:$0x3] }
  0x15   : > { %1109 = vset.pattern.permute.xlu2 %v1213_v2  ;;  %s1010_s28 = sshll.u32 %s1295_s27, 4  ;;  %v246_v21 = vunpack.c.l.bf16 %v245_v20  ;;  %s934_s10 = sshll.u32 %s1295_s27, 3  ;;  %vm496_vm1 = vcmask 259076   ;;  %vm368_vm2 = vcmask 261120   ;;  %vm504_vm3 = vcmask 254976  }
  0x16   : > { %s1301_s5 = scalar_lea.vmem %s1476_s1, %s1010_s28  ;;  %s207_s13 = scalar_lea.vmem %s1475_s0, %s934_s10  ;;  %vm425_vm4 = vcmask 523264   ;;  %vm824_vm10 = vcmask 253952   ;;  %vm777_vm12 = vcmask 517120  }
  0x17   : > { %v1304_v3 = vld [vmem:[%s1301_s5 + $0x8] sm:$0xff]   ;;  %v1307_v4 = vld [vmem:[%s1301_s5] sm:$0xff]   ;;  %v275_v22 = vperm.slane %v246_v21, 0  ;;  %v321_v26 = vperm.slane %v246_v21, 2  ;;  %v296_v27 = vperm.slane %v246_v21, 1  ;;  %v346_v28 = vperm.slane %v246_v21, 3 }
  0x18   : > { %v253_v5 = vunpack.c.l.bf16 %v1304_v3  ;;  %v254_v6 = vunpack.c.h.bf16 %v1304_v3  ;;  %v251_v7 = vunpack.c.l.bf16 %v1307_v4  ;;  %v252_v8 = vunpack.c.h.bf16 %v1307_v4  ;;  %v1337_v21 = vld [vmem:[%s207_s13] sm:$0xff]  ;;  %v1017_v3 = vld [vmem:[%s1477_s2 + $0x30] sm:$0xff]  ;;  %s1007_s10 = sshll.u32 %s1266_s19, 3  ;;  %s843_s19 = scalar_lea.sflag [#allocation3], %s201_s8 }
  0x19   : > { %vm215_vm0 = vcmp.gt.f32.partialorder %v1337_v21, 0.5  ;;  %vm783_vm9 = vcmp.gt.f32.partialorder %v1337_v21, 0.0  ;;  %s853_s13 = scalar_lea.hbm %s1479_s4, %s1007_s10 }
  0x1a   : > { %v1098_v9 = vpack.i.bf16 %v254_v6, %v253_v5  ;;  %v1110_v10 = vpack.i.bf16 %v252_v8, %v251_v7  ;;  %s857_s22 = sshll.u32 %s853_s13, 4  ;;  %s858_s22 = int_to_ptr.hbm [resolvable:$true] %s857_s22 }
  0x1b   : > { %s1161_s23 = sshra.s32 %s858_s22, 4  ;;  %s1162_s23 = int_to_ptr.hbm [resolvable:$true] %s1161_s23 }
  0x1c   : > { %1099 = vperm.xlu1 %1097, %v1098_v9   ;;  %1087 = vperm.xlu0 %1085, %v1098_v9   ;;  %s1163_s27 = scalar_lea.hbm %s1162_s23, 8  ;;  %p1168_p0 = scmp.lt.s32.totalorder %s1162_s23, %s1479_s4 }
  0x1d   : > { %1111 = vperm.xlu2 %1109, %v1110_v10   ;;  %p1164_p11 = scmp.ne.s32.totalorder %s1162_s23, %s1163_s27  ;;  %p1169_p1 = scmp.lt.s32.totalorder %s1167_s30, %s1163_s27 }
  0x1f   : > { %p1165_p12 = pnand %p1164_p11, %p1283_p5  ;;  %p1170_p2 = por %p1169_p1, %p1168_p0 }
  0x21   : > { %p1166_p13 = pneg %p1165_p12 }
  0x23   : > { %p1171_p3 = pnand %p1170_p2, %p1166_p13 }
  0x24   : > { %1103 = vset.pattern.permute.xlu1 %v1212_v1  ;;  %1091 = vset.pattern.permute.xlu0 %v1213_v2 }
  0x25   : > { %1093 = vperm.xlu0 %1091, %v1098_v9   ;;  %1105 = vperm.xlu1 %1103, %v1110_v10  }
  0x26   : > { %1115 = vset.pattern.permute.xlu2 %v1214_v11 }
  0x27   : > { %1117 = vperm.xlu2 %1115, %v1098_v9  }
  0x2d   : > { %1121 = vset.pattern.permute.xlu1 %v1211_v0  ;;  %1132 = vset.pattern.permute.xlu0 %v1215_v13 }
  0x2e   : > { %1123 = vperm.xlu1 %1121, %v1110_v10   ;;  %465 = vperm.xlu0 %1132, %v1324_v12  }
  0x2f   : > { %1128 = vperm.xlu2 %1115, %v1110_v10  }
  0x36   : > { %1133 = vset.pattern.permute.xlu1 %v1216_v14  ;;  %1136 = vset.pattern.permute.xlu0 %v1217_v15 }
  0x37   : > { %459 = vperm.xlu1 %1133, %v1324_v12   ;;  %1134 = vset.pattern.permute.xlu2 %v1218_v16 }
  0x38   : > { %475 = vperm.xlu2 %1134, %v1324_v12  }
  0x3f   : > { %1135 = vset.pattern.permute.xlu1 %v1217_v15 }
  0x40   : > { %485 = vperm.xlu1 %1135, %v1324_v12  }
  0x77   : > { %v1112_v17 = vpop.permute.xlu2 %1111 }
  0x78   : > { %v1114_v39 = vunpack.i.h.bf16 %v1112_v17  ;;  %v1113_v40 = vunpack.i.l.bf16 %v1112_v17 }
  0x7a   : > { %v298_v54 = vmul.f32 %v1114_v39, %v296_v27  ;;  %v297_v55 = vmul.f32 %v1113_v40, %v296_v27 }
  0x81   : > { %v1118_v25 = vpop.permute.xlu2 %1117 }
  0x82   : > { %v1120_v32 = vunpack.i.h.bf16 %v1118_v25  ;;  %v1119_v33 = vunpack.i.l.bf16 %v1118_v25 }
  0x84   : > { %v350_v43 = vmul.f32 %v1120_v32, %v346_v28  ;;  %v349_v44 = vmul.f32 %v1119_v33, %v346_v28 }
  0x89   : > { %v1129_v51 = vpop.permute.xlu2 %1128 }
  0x8a   : > { %v1131_v61 = vunpack.i.h.bf16 %v1129_v51  ;;  %v1130_v62 = vunpack.i.l.bf16 %v1129_v51 }
  0x8c   : > { %v348_v14 = vmul.f32 %v1131_v61, %v346_v28  ;;  %v347_v15 = vmul.f32 %v1130_v62, %v346_v28  ;;  %v1013_v61 = vld [vmem:[%s1477_s2 + $0x10] sm:$0xff]  ;;  %v1012_v62 = vld [vmem:[%s1477_s2 + $0x8] sm:$0xff] }
  0x8e   : > { %v1100_v18 = vpop.permute.xlu1 %1099  ;;  %v1088_v19 = vpop.permute.xlu0 %1087 }
  0x8f   : > { %v1090_v23 = vunpack.i.h.bf16 %v1088_v19  ;;  %v1089_v24 = vunpack.i.l.bf16 %v1088_v19  ;;  %v1102_v29 = vunpack.i.h.bf16 %v1100_v18  ;;  %v1101_v30 = vunpack.i.l.bf16 %v1100_v18 }
  0x91   : > { %v279_v35 = vmul.f32 %v1090_v23, %v275_v22  ;;  %v278_v36 = vmul.f32 %v1089_v24, %v275_v22  ;;  %v325_v47 = vmul.f32 %v1102_v29, %v321_v26  ;;  %v324_v48 = vmul.f32 %v1101_v30, %v321_v26 }
  0x97   : > { %v1094_v31 = vpop.permute.xlu0 %1093  ;;  %v1106_v34 = vpop.permute.xlu1 %1105 }
  0x98   : > { %v1096_v37 = vunpack.i.h.bf16 %v1094_v31  ;;  %v1095_v38 = vunpack.i.l.bf16 %v1094_v31  ;;  %v1108_v45 = vunpack.i.h.bf16 %v1106_v34  ;;  %v1107_v46 = vunpack.i.l.bf16 %v1106_v34 }
  0x9a   : > { %v300_v41 = vmul.f32 %v1096_v37, %v296_v27  ;;  %v299_v42 = vmul.f32 %v1095_v38, %v296_v27  ;;  %v277_v56 = vmul.f32 %v1108_v45, %v275_v22  ;;  %v276_v57 = vmul.f32 %v1107_v46, %v275_v22  ;;  %v476_v22 = vpop.permute.xlu2 %475 }
  0x9c   : > { %v303_v49 = vadd.f32 %v299_v42, %v278_v36  ;;  %v304_v50 = vadd.f32 %v300_v41, %v279_v35  ;;  %v302_v2 = vadd.f32 %v298_v54, %v277_v56  ;;  %v301_v9 = vadd.f32 %v297_v55, %v276_v57  ;;  %v1023_v42 = vld [vmem:[%s1301_s5] sm:$0xff] }
  0x9e   : > { %v328_v52 = vadd.f32 %v324_v48, %v303_v49  ;;  %v329_v53 = vadd.f32 %v325_v47, %v304_v50 }
  0xa0   : > { %v1124_v58 = vpop.permute.xlu1 %1123  ;;  %v353_v59 = vadd.f32 %v349_v44, %v328_v52  ;;  %v354_v60 = vadd.f32 %v350_v43, %v329_v53  ;;  %v466_v13 = vpop.permute.xlu0 %465  ;;  %v1024_v43 = vld [vmem:[%s1301_s5 + $0x8] sm:$0xff] }
  0xa1   : > { %v1126_v63 = vunpack.i.h.bf16 %v1124_v58  ;;  %v1125_v0 = vunpack.i.l.bf16 %v1124_v58  ;;  %v467_v18 = vrot.slane %v466_v13, 5 }
  0xa2   : > { %v356_v1 = vpack.c.bf16 %v354_v60, %v353_v59  ;;  %v1014_v60 = vld [vmem:[%s1477_s2 + $0x18] sm:$0xff] }
  0xa3   : > { %v323_v10 = vmul.f32 %v1126_v63, %v321_v26  ;;  %v322_v11 = vmul.f32 %v1125_v0, %v321_v26  ;;  %v469_v25 = vmul.f32 %v467_v18, %v1337_v21  ;;  %v477_v26 = vrot.slane %v476_v22, 4  ;;  %v1011_v63 = vld [vmem:[%s1477_s2] sm:$0xff] }
  0xa4   : > { %381 = vmatpush.bf16.msra.mxu0 %v356_v1  ;;  %1035 = vmatpush.bf16.msra.mxu1 %v356_v1  ;;  %v357_v1 = vperm.slane %v1324_v12, 0 }
  0xa5   : > { %v326_v16 = vadd.f32 %v322_v11, %v301_v9  ;;  %v327_v17 = vadd.f32 %v323_v10, %v302_v2  ;;  %v471_v29 = vrot.slane %v469_v25, 1  ;;  %v479_v30 = vmul.f32 %v477_v26, %v1337_v21 }
  0xa7   : > { %v351_v19 = vadd.f32 %v347_v15, %v326_v16  ;;  %v352_v20 = vadd.f32 %v348_v14, %v327_v17  ;;  %v481_v32 = vrot.slane %v479_v30, 2 }
  0xa9   : > { %v460_v23 = vpop.permute.xlu1 %459  ;;  %v355_v24 = vpack.c.bf16 %v352_v20, %v351_v19 }
  0xaa   : > { %v461_v27 = vrot.slane %v460_v23, 6 }
  0xab   : > { %382 = vmatpush.bf16.msra.mxu0 %v355_v24  ;;  %1036 = vmatpush.bf16.msra.mxu1 %v355_v24 }
  0xac   : > { %v463_v28 = vmul.f32 %v461_v27, %v1337_v21 }
  0xae   : > { %v473_v33 = vadd.f32 %v471_v29, %v463_v28  ;;  %945 = vmatmul.msk.bf16.vlgmr.msra.gmra.mxu0 %vm368_vm2, %v1023_v42  ;;  %946 = vmatmul.msk.bf16.vlgmr.msra.gmra.mxu1 %vm368_vm2, %v1024_v43 }
  0xaf   : > { %436 = vmatpush.bf16.msrb.mxu1 %v1014_v60 }
  0xb0   : > { %v483_v36 = vadd.f32 %v481_v32, %v473_v33 }
  0xb2   : > { %v486_v31 = vpop.permute.xlu1 %485 }
  0xb3   : > { %v487_v34 = vrot.slane %v486_v31, 3  ;;  %437 = vmatpush.bf16.msrb.mxu1 %v1013_v61 }
  0xb5   : > { %v489_v35 = vmul.f32 %v487_v34, %v1337_v21 }
  0xb7   : > { %v491_v37 = vrot.slane %v489_v35, 3  ;;  %438 = vmatpush.bf16.msrb.mxu1 %v1012_v62 }
  0xb9   : > { %v493_v38 = vadd.f32 %v491_v37, %v483_v36 }
  0xbb   : > { %v494_v39 = vperm.slane %v493_v38, 0  ;;  %439 = vmatpush.bf16.msrb.mxu1 %v1011_v63 }
  0xbd   : > { %v495_v40 = vsel %vm215_vm0, %v494_v39, -1e+30 }
  0xbe   : > { %v497_v41 = vsel %vm496_vm1, %v495_v40, -inf }
  0xbf   : > { %498 = vmax.xlane.f32.xlu2 %v497_v41 }
 0x12b   : > { %v384_v0 = vpop.f32.mrf.mxu0  ;;  %v389_v15 = vpop.f32.mrf.mxu1 }
 0x12c   : > { %v385_v2 = vadd.f32 %v384_v0, %v357_v1  ;;  %v390_v17 = vadd.f32 %v389_v15, %v357_v1 }
 0x12e   : > { %v394_v10 = vmax.f32 %v385_v2, 0.0  ;;  %v396_v19 = vmax.f32 %v390_v17, 0.0 }
 0x132   : > { %v499_v44 = vpop.xlane.xlu2 %498 }
 0x133   : > { %v500_v45 = vmul.f32 %v499_v44, %v1337_v21  ;;  %v386_v9 = vpop.f32.mrf.mxu0  ;;  %v391_v16 = vpop.f32.mrf.mxu1 }
 0x134   : > { %v387_v11 = vadd.f32 %v386_v9, %v357_v1  ;;  %v392_v18 = vadd.f32 %v391_v16, %v357_v1  ;;  %v784_v1 = vsel %vm783_vm9, %v1337_v21, 1.0 }
 0x135   : > { %v502_v46 = vrot.slane %v500_v45, 4 }
 0x136   : > { %v395_v13 = vmax.f32 %v387_v11, 0.0  ;;  %v397_v20 = vmax.f32 %v392_v18, 0.0 }
 0x137   : > { %v505_v47 = vsel %vm504_vm3, %v502_v46, 0.0 }
 0x138   : > { %v506_v48 = vrot.slane %v505_v47, 4  ;;  %v398_v14 = vpack.c.bf16 %v395_v13, %v394_v10  ;;  %v399_v22 = vpack.c.bf16 %v397_v20, %v396_v19 }
 0x13a   : > { %v507_v49 = vadd.f32 %v506_v48, %v505_v47  ;;  %963 = vmatmul.msk.bf16.vlgmr.msrb.gmra.mxu1 %vm425_vm4, %v398_v14 }
 0x13c   : > { %v508_v50 = vrot.slane %v507_v49, 2 }
 0x13e   : > { %v509_v51 = vadd.f32 %v508_v50, %v507_v49  ;;  %v400_v50 = vperm.slane %v1324_v12, 1 }
 0x140   : > { %v510_v52 = vrot.slane %v509_v51, 1 }
 0x142   : > { %v511_v53 = vadd.f32 %v510_v52, %v509_v51 }
 0x144   : > { %v512_v54 = vsub.f32 %v493_v38, %v511_v53 }
 0x146   : > { %v513_v55 = vmul.f32 1.442695, %v512_v54 }
 0x148   : > { %1137 = vpow2.f32 %v513_v55 }
 0x14a   : > { %964 = vmatmul.msk.bf16.gmra.mxu1 %vm425_vm4, %v399_v22 }
 0x14e   : > { %v1138_v56 = vpop.eup %1137 }
 0x14f   : > { %v515_v57 = vperm.slane %v1138_v56, 0 }
 0x151   : > { %v516_v58 = vmul.f32 %v515_v57, %v1337_v21 }
 0x153   : > { %v517_v59 = vsel %vm496_vm1, %v516_v58, 0.0 }
 0x154   : > { %518 = vadd.xlane.f32.xlu0 %v517_v59 }
 0x1b7   : > { %v441_v47 = vpop.f32.mrf.mxu1 }
 0x1b8   : > { %v442_v53 = vadd.f32 %v441_v47, %v400_v50 }
 0x1bf   : > { %v443_v48 = vpop.f32.mrf.mxu1 }
 0x1c0   : > { %v444_v54 = vadd.f32 %v443_v48, %v400_v50 }
 0x1c2   : > { %v452_v59 = vmax.f32 %v444_v54, 0.0 }
 0x1c7   : > { %v519_v23 = vpop.xlane.xlu0 %518  ;;  %v446_v49 = vpop.f32.mrf.mxu1 }
 0x1c8   : > { %v520_v24 = vmul.f32 %v519_v23, %v1337_v21  ;;  %v447_v51 = vadd.f32 %v446_v49, %v400_v50 }
 0x1ca   : > { %v522_v25 = vrot.slane %v520_v24, 4  ;;  %v453_v55 = vmax.f32 %v447_v51, 0.0 }
 0x1cc   : > { %v524_v26 = vsel %vm504_vm3, %v522_v25, 0.0 }
 0x1cd   : > { %v525_v27 = vrot.slane %v524_v26, 4 }
 0x1cf   : > { %v526_v29 = vadd.f32 %v525_v27, %v524_v26  ;;  %v448_v52 = vpop.f32.mrf.mxu1  ;;  %v1219_v27 = vmov 0.0  }
 0x1d0   : > { %v449_v57 = vadd.f32 %v448_v52, %v400_v50 }
 0x1d1   : > { %v527_v30 = vrot.slane %v526_v29, 2 }
 0x1d2   : > { %v454_v58 = vmax.f32 %v449_v57, 0.0 }
 0x1d3   : > { %v528_v28 = vadd.f32 %v527_v30, %v526_v29 }
 0x1d4   : > { %v456_v60 = vpack.c.bf16 %v454_v58, %v453_v55 }
 0x1d5   : > { %v529_v31 = vrot.slane %v528_v28, 1 }
 0x1d6   : > { %627 = vmatpush.bf16.msra.mxu2 %v456_v60 }
 0x1d7   : > { %v530_v32 = vadd.f32 %v529_v31, %v528_v28 }
 0x1d9   : > { %1139 = vrcp.f32 %v530_v32  ;;  %v542_v36 = vand.u32 2147483648, %v530_v32  ;;  %v540_v38 = vand.u32 2147483647, %v530_v32  ;;  %vm536_vm6 = vweird.f32 %v530_v32 }
 0x1db   : > { %v543_v40 = vor.u32 1.1754944e-38, %v542_v36  ;;  %vm541_vm8 = vcmp.eq.f32.partialorder %v540_v38, 8.507059e+37 }
 0x1df   : > { %v1140_v33 = vpop.eup %1139 }
 0x1e0   : > { %v532_v34 = vmul.f32 %v1140_v33, %v530_v32  ;;  %vm537_vm5 = vweird.f32 %v1140_v33 }
 0x1e1   : > { %vm538_vm7 = vmor %vm536_vm6, %vm537_vm5 }
 0x1e2   : > { %v533_v35 = vsub.f32 1.0, %v532_v34 }
 0x1e4   : > { %v534_v37 = vmul.f32 %v1140_v33, %v533_v35 }
 0x1e6   : > { %v535_v39 = vadd.f32 %v1140_v33, %v534_v37 }
 0x1e8   : > { %v539_v41 = vsel %vm538_vm7, %v1140_v33, %v535_v39 }
 0x1e9   : > { %v544_v42 = vsel %vm541_vm8, %v543_v40, %v539_v41 }
 0x1ea   : > { %v545_v43 = vmul.f32 %v1138_v56, %v544_v42  ;;  %v451_v56 = vmax.f32 %v442_v53, 0.0  ;;  %v1033_v42 = vld [vmem:[%s1477_s2 + $0x60] sm:$0xff]  }
 0x1eb   : > { %v1027_v48 = vunpack.c.l.bf16 %v1033_v42  ;;  %v1028_v49 = vunpack.c.h.bf16 %v1033_v42 }
 0x1ec   : > { %v546_v44 = vperm.slane %v545_v43, 0  ;;  %v455_v61 = vpack.c.bf16 %v452_v59, %v451_v56  ;;  %v787_v62 = vadd.f32 1e-14, %v545_v43 }
 0x1ee   : > { %v547_v45 = vsel %vm215_vm0, %v546_v44, -1e+30  ;;  %628 = vmatpush.bf16.msra.mxu2 %v455_v61  ;;  %1141 = vlog2.f32 %v787_v62 }
 0x1ef   : > { %v548_v46 = vsel %vm496_vm1, %v547_v45, -inf  ;;  %1143 = vlog2.f32 %v784_v1 }
 0x1f0   : > { %549 = vmax.xlane.f32.xlu1 %v548_v46 }
 0x1f4   : > { %v1142_v10 = vpop.eup %1141 }
 0x1f5   : > { %v789_v14 = vmul.f32 0.6931472, %v1142_v10  ;;  %v1144_v15 = vpop.eup %1143 }
 0x1f6   : > { %v786_v18 = vmul.f32 0.6931472, %v1144_v15 }
 0x1f7   : > { %v791_v19 = vrot.slane %v789_v14, 2 }
 0x1f9   : > { %v793_v23 = vsub.f32 %v786_v18, %v791_v19 }
 0x1fb   : > { %v794_v26 = vmul.f32 %v793_v23, %v1337_v21 }
 0x1fd   : > { %v795_v33 = vsel %vm783_vm9, %v794_v26, 0.0 }
 0x263   : > { %v550_v63 = vpop.xlane.xlu1 %549 }
 0x264   : > { %v965_v0 = vadd.f32 -1e-07, %v550_v63 }
 0x266   : > { %v552_v2 = vmin.f32 %v965_v0, 0.05 }
 0x268   : > { %v553_v9 = vmul.f32 %v552_v2, %v1337_v21 }
 0x26a   : > { %v555_v11 = vrot.slane %v553_v9, 4 }
 0x26c   : > { %v557_v13 = vsel %vm504_vm3, %v555_v11, 0.0  ;;  %vm837_vm3 = vcmask 23552  }
 0x26d   : > { %v558_v16 = vrot.slane %v557_v13, 4 }
 0x26f   : > { %v559_v17 = vadd.f32 %v558_v16, %v557_v13 }
 0x271   : > { %v560_v20 = vrot.slane %v559_v17, 2 }
 0x273   : > { %v561_v22 = vadd.f32 %v560_v20, %v559_v17 }
 0x275   : > { %v562_v24 = vrot.slane %v561_v22, 1 }
 0x277   : > { %v563_v25 = vadd.f32 %v562_v24, %v561_v22 }
 0x279   : > { %vm564_vm11 = vcmp.gt.f32.partialorder %v545_v43, %v563_v25  ;;  %v1015_v25 = vld [vmem:[%s1477_s2 + $0x20] sm:$0xff] }
 0x27a   : > { %v966_v29 = vsel %vm564_vm11, 1.0, %v1219_v27 }
 0x27b   : > { %v825_v30 = vsel %vm824_vm10, %v966_v29, 0.0  ;;  %v567_v28 = vmul.f32 %v966_v29, %v545_v43  ;;  %v752_v31 = vperm.slane %v966_v29, 0  ;;  %v797_v32 = vrot.slane %v966_v29, 2 }
 0x27c   : > { %826 = vadd.xlane.f32.xlu0 %v825_v30 }
 0x27d   : > { %v568_v34 = vpack.c.bf16 %v567_v28, %v567_v28  ;;  %v582_v35 = vsub.f32 %v545_v43, %v567_v28  ;;  %v1386_v36 = vmul.f32 %v752_v31, %v1337_v21  ;;  %v799_v37 = vmul.f32 %v797_v32, %v795_v33  ;;  %v1022_v32 = vld [vmem:[%s1477_s2 + $0x58] sm:$0xff]  ;;  %v1021_v33 = vld [vmem:[%s1477_s2 + $0x50] sm:$0xff] }
 0x27e   : > { %733 = vmatpush.bf16.msrb.mxu0 %v1022_v32 }
 0x27f   : > { %v570_v38 = vpack.i.b16 %v568_v34, %v568_v34  ;;  %v583_v39 = vpack.c.bf16 %v582_v35, %v582_v35  ;;  %v805_v40 = vsel %vm496_vm1, %v1386_v36, 0.0  ;;  %v800_v41 = vperm.slane %v799_v37, 6  ;;  %v1020_v34 = vld [vmem:[%s1477_s2 + $0x48] sm:$0xff]  ;;  %v1019_v35 = vld [vmem:[%s1477_s2 + $0x40] sm:$0xff] }
 0x280   : > { %806 = vadd.xlane.f32.xlu2 %v805_v40 }
 0x281   : > { %v572_v44 = vperm.slane %v570_v38, 0  ;;  %v585_v45 = vpack.i.b16 %v583_v39, %v583_v39  ;;  %v801_v46 = vmul.f32 %v800_v41, %v1337_v21  ;;  %v1034_v21 = vld [vmem:[%s1477_s2 + $0x68] sm:$0xff]   ;;  %v642_v38 = vperm.slane %v1324_v12, 2 }
 0x282   : > { %v1031_v60 = vunpack.c.l.bf16 %v1034_v21  ;;  %v1032_v61 = vunpack.c.h.bf16 %v1034_v21  ;;  %734 = vmatpush.bf16.msrb.mxu0 %v1021_v33 }
 0x283   : > { %v573_v43 = vunpack.c.l.bf16 %v572_v44  ;;  %v587_v47 = vperm.slane %v585_v45, 0  ;;  %v802_v53 = vsel %vm496_vm1, %v801_v46, 0.0  ;;  %vm833_vm1 = vcmask 7168  }
 0x285   : > { %v592_v50 = vunpack.c.l.bf16 %v587_v47  ;;  %v574_v51 = vmul.f32 %v573_v43, %v251_v7  ;;  %v575_v52 = vmul.f32 %v573_v43, %v252_v8  ;;  %v576_v10 = vmul.f32 %v573_v43, %v253_v5  ;;  %v1018_v5 = vld [vmem:[%s1477_s2 + $0x38] sm:$0xff] }
 0x286   : > { %v577_v11 = vmul.f32 %v573_v43, %v254_v6  ;;  %677 = vmatpush.bf16.msra.mxu3 %v1018_v5  ;;  %v1016_v6 = vld [vmem:[%s1477_s2 + $0x28] sm:$0xff]  ;;  %735 = vmatpush.bf16.msrb.mxu0 %v1020_v34 }
 0x287   : > { %v578_v54 = vpack.c.bf16 %v574_v51, %v574_v51  ;;  %v579_v55 = vpack.c.bf16 %v575_v52, %v575_v52  ;;  %v593_v57 = vmul.f32 %v1027_v48, %v592_v50  ;;  %v594_v58 = vmul.f32 %v1028_v49, %v592_v50 }
 0x288   : > { %803 = vadd.xlane.f32.xlu2 %v802_v53  ;;  %v595_v2 = vmul.f32 %v1031_v60, %v592_v50  ;;  %v596_v9 = vmul.f32 %v1032_v61, %v592_v50  ;;  %v580_v15 = vpack.c.bf16 %v576_v10, %v576_v10  ;;  %v581_v16 = vpack.c.bf16 %v577_v11, %v577_v11 }
 0x289   : > { %v597_v56 = vpack.c.bf16 %v593_v57, %v593_v57  ;;  %v598_v59 = vpack.c.bf16 %v594_v58, %v594_v58  ;;  %v601_v62 = vunpack.c.l.bf16 %v578_v54  ;;  %v602_v7 = vunpack.c.l.bf16 %v579_v55 }
 0x28a   : > { %v599_v13 = vpack.c.bf16 %v595_v2, %v595_v2  ;;  %v600_v14 = vpack.c.bf16 %v596_v9, %v596_v9  ;;  %v603_v19 = vunpack.c.l.bf16 %v580_v15  ;;  %v604_v20 = vunpack.c.l.bf16 %v581_v16  ;;  %678 = vmatpush.bf16.msra.mxu3 %v1017_v3  ;;  %736 = vmatpush.bf16.msrb.mxu0 %v1019_v35 }
 0x28b   : > { %v605_v63 = vunpack.c.l.bf16 %v597_v56  ;;  %v606_v4 = vunpack.c.l.bf16 %v598_v59  ;;  %v698_v55 = vperm.slane %v1324_v12, 3 }
 0x28c   : > { %v607_v17 = vunpack.c.l.bf16 %v599_v13  ;;  %v608_v18 = vunpack.c.l.bf16 %v600_v14 }
 0x28d   : > { %v609_v8 = vadd.f32 %v605_v63, %v601_v62  ;;  %v610_v0 = vadd.f32 %v606_v4, %v602_v7  ;;  %v754_v4 = vpack.c.bf16 %v1386_v36, %v1386_v36 }
 0x28e   : > { %v611_v22 = vadd.f32 %v607_v17, %v603_v19  ;;  %v612_v23 = vadd.f32 %v608_v18, %v604_v20  ;;  %679 = vmatpush.bf16.msra.mxu3 %v1016_v6 }
 0x28f   : > { %v613_v1 = vpack.c.bf16 %v610_v0, %v609_v8  ;;  %v758_v0 = vrot.slane %v754_v4, 2 }
 0x290   : > { %v614_v24 = vpack.c.bf16 %v612_v23, %v611_v22 }
 0x291   : > { %967 = vmatmul.msk.bf16.vlgmr.msra.gmra.mxu2 %vm368_vm2, %v613_v1  ;;  %v775_v1 = vperm.slane %v1324_v12, 4 }
 0x292   : > { %680 = vmatpush.bf16.msra.mxu3 %v1015_v25  ;;  %v781_v25 = vperm.slane %v1324_v12, 5 }
 0x2a1   : > { %968 = vmatmul.msk.bf16.gmra.mxu2 %vm368_vm2, %v614_v24 }
 0x2ef   : > { %v827_v5 = vpop.xlane.xlu0 %826 }
 0x2f3   : > { %v807_v13 = vpop.xlane.xlu2 %806 }
 0x2f4   : > { %v808_v14 = vmax.f32 %v807_v13, 1.0 }
 0x2f6   : > { %1145 = vrcp.f32 %v808_v14  ;;  %v820_v19 = vand.u32 2147483648, %v808_v14  ;;  %vm814_vm14 = vweird.f32 %v808_v14  ;;  %v818_v20 = vand.u32 2147483647, %v808_v14 }
 0x2f8   : > { %v821_v23 = vor.u32 1.1754944e-38, %v820_v19  ;;  %vm819_vm0 = vcmp.eq.f32.partialorder %v818_v20, 8.507059e+37 }
 0x2fb   : > { %v804_v3 = vpop.xlane.xlu2 %803 }
 0x2fc   : > { %v1146_v15 = vpop.eup %1145 }
 0x2fd   : > { %v810_v16 = vmul.f32 %v1146_v15, %v808_v14  ;;  %vm815_vm13 = vweird.f32 %v1146_v15 }
 0x2fe   : > { %vm816_vm15 = vmor %vm814_vm14, %vm815_vm13 }
 0x2ff   : > { %v811_v36 = vsub.f32 1.0, %v810_v16 }
 0x301   : > { %v812_v17 = vmul.f32 %v1146_v15, %v811_v36 }
 0x303   : > { %v813_v18 = vadd.f32 %v1146_v15, %v812_v17 }
 0x305   : > { %v817_v22 = vsel %vm816_vm15, %v1146_v15, %v813_v18 }
 0x306   : > { %v822_v24 = vsel %vm819_vm0, %v821_v23, %v817_v22 }
 0x307   : > { %v823_v6 = vmul.f32 %v822_v24, %v804_v3 }
 0x314   : > { %v630_v26 = vpop.f32.mrf.mxu2 }
 0x31c   : > { %v632_v27 = vpop.f32.mrf.mxu2 }
 0x31d   : > { %v640_v29 = vpack.c.bf16 %v632_v27, %v630_v26  ;;  %v828_v26 = vmul.f32 0.03125, %v827_v5 }
 0x31f   : > { %985 = vmatmul.msk.bf16.vlgmr.msra.gmra.mxu3 %vm425_vm4, %v640_v29  ;;  %v831_v29 = vrot.slane %v823_v6, 4 }
 0x324   : > { %v635_v30 = vpop.f32.mrf.mxu2 }
 0x32c   : > { %v637_v28 = vpop.f32.mrf.mxu2 }
 0x32d   : > { %v641_v31 = vpack.c.bf16 %v637_v28, %v635_v30  ;;  %v829_v28 = vperm.slane %v828_v26, 0 }
 0x32f   : > { %986 = vmatmul.msk.bf16.gmra.mxu3 %vm425_vm4, %v641_v31 }
 0x3a2   : > { %v682_v37 = vpop.f32.mrf.mxu3 }
 0x3a3   : > { %v683_v39 = vadd.f32 %v682_v37, %v642_v38 }
 0x3a5   : > { %v692_v42 = vmax.f32 %v683_v39, 0.0 }
 0x3aa   : > { %v684_v40 = vpop.f32.mrf.mxu3 }
 0x3ab   : > { %v685_v41 = vadd.f32 %v684_v40, %v642_v38 }
 0x3ad   : > { %v693_v44 = vmax.f32 %v685_v41, 0.0 }
 0x3af   : > { %v696_v45 = vpack.c.bf16 %v693_v44, %v692_v42 }
 0x3b1   : > { %1003 = vmatmul.msk.bf16.vlgmr.msrb.gmra.mxu0 %vm425_vm4, %v696_v45 }
 0x3b2   : > { %v687_v46 = vpop.f32.mrf.mxu3 }
 0x3b3   : > { %v688_v43 = vadd.f32 %v687_v46, %v642_v38 }
 0x3b5   : > { %v694_v49 = vmax.f32 %v688_v43, 0.0 }
 0x3ba   : > { %v689_v47 = vpop.f32.mrf.mxu3 }
 0x3bb   : > { %v690_v48 = vadd.f32 %v689_v47, %v642_v38 }
 0x3bd   : > { %v695_v50 = vmax.f32 %v690_v48, 0.0 }
 0x3bf   : > { %v697_v51 = vpack.c.bf16 %v695_v50, %v694_v49 }
 0x3c1   : > { %1004 = vmatmul.msk.bf16.gmra.mxu0 %vm425_vm4, %v697_v51  ;;  %vm839_vm4 = vcmask 1041408  }
 0x42e   : > { %v738_v52 = vpop.f32.mrf.mxu0 }
 0x42f   : > { %v739_v59 = vadd.f32 %v738_v52, %v698_v55 }
 0x431   : > { %v748_v63 = vmax.f32 %v739_v59, 0.0 }
 0x436   : > { %v740_v53 = vpop.f32.mrf.mxu0 }
 0x437   : > { %v741_v21 = vadd.f32 %v740_v53, %v698_v55 }
 0x439   : > { %v749_v62 = vmax.f32 %v741_v21, 0.0 }
 0x43b   : > { %v755_v8 = vpack.c.bf16 %v749_v62, %v748_v63 }
 0x43e   : > { %v743_v54 = vpop.f32.mrf.mxu0 }
 0x43f   : > { %v744_v57 = vadd.f32 %v743_v54, %v698_v55 }
 0x441   : > { %v750_v60 = vmax.f32 %v744_v57, 0.0 }
 0x446   : > { %v745_v58 = vpop.f32.mrf.mxu0 }
 0x447   : > { %v746_v56 = vadd.f32 %v745_v58, %v698_v55 }
 0x449   : > { %v751_v61 = vmax.f32 %v746_v56, 0.0 }
 0x44b   : > { %v756_v7 = vpack.c.bf16 %v751_v61, %v750_v60 }
 0x44d   : > { %768 = vmatpush.bf16.msrb.mxu2 %v756_v7 }
 0x451   : > { %769 = vmatpush.bf16.msrb.mxu2 %v755_v8 }
 0x454   : > { %1005 = vmatmul.msk.bf16.vlgmr.msrb.gmra.mxu2 %vm368_vm2, %v758_v0  ;;  %vm835_vm2 = vcmask 15360  }
 0x4d7   : > { %v771_v2 = vpop.f32.mrf.mxu2 }
 0x4d8   : > { %v776_v9 = vmul.f32 %v775_v1, %v771_v2 }
 0x4da   : > { %v778_v10 = vsel %vm777_vm12, %v776_v9, 0.0 }
 0x4db   : > { %779 = vadd.xlane.f32.xlu1 %v778_v10 }
 0x4df   : > { %v773_v11 = vpop.f32.mrf.mxu2 }
 0x54e   : > { %v780_v27 = vpop.xlane.xlu1 %779 }
 0x54f   : > { %v782_v30 = vadd.f32 %v781_v25, %v780_v27 }
 0x551   : > { %v834_v31 = vsel %vm833_vm1, %v782_v30, %v831_v29 }
 0x552   : > { %v836_v32 = vsel %vm835_vm2, %v834_v31, %v829_v28 }
 0x553   : > { %v838_v12 = vsel %vm837_vm3, %v836_v32, 0.0 }
 0x554   : > { %v840_v33 = vsel %vm839_vm4, %v838_v12, 0.0 }
 0x555   : > { %841 = vst [vmem:[%s203_s14] sm:$0xff] %v840_v33 }
 0x556   : > { %1174 = shalt.err (!%p1171_p3)
}
 0x557   : > { %1037 = dma.vmem_to_hbm [thread:$0]  (%p1283_p5), %s856_s20, 128, %s858_s22, %s843_s19  }
 0x558 PF: > { %p1043_p4 = scmp.ge.s32.totalorder %s1209_s18, 2  ;;  %s869_s7 = sand.u32 1, %s1197_s15  }
 0x559   : > { %s870_s8 = scalar_lea.sflag [#allocation3], %s869_s7 }
 0x55a   : > { %p1040_p7 = pnand %p1043_p4, %p1287_p6 }
 0x55c   : > { %p1041_p8 = pneg %p1040_p7 }
 0x55e   : > { %1192 = dma.done.wait (%p1041_p8), %s870_s8, 128  }
 0x55f   : > { %1194 = vsyncadd (%p1041_p8), %s870_s8, 4294967168  ;;  %p14_p9 = scmp.ge.s32.totalorder %s1270_s21, 6   ;;  %s1482_s15 = smov %s1201_s16 }
 0x560   : > { %s1483_s16 = smov %s1205_s17  ;;  %s1484_s17 = smov %s1281_s24 }
 0x561   : > { %s1485_s18 = smov %s1270_s21  ;;  %16 = sbr.rel (!%p14_p9) target bundleno = 3 (0x3), region = 74 }
 0x566   :  { %876 = vsyncpa [#allocation3], 1 }
 0x567   :  { %878 = vsyncpa [#allocation3 + $0x1], 1 }

</bundles_post_ra>
